<compile_context>
chip_gen: v7x
topology: tpu7x:2x2x1
jax: 0.10.0
libtpu: 0.0.40
codegen_flags: <defaults>
</compile_context>

<pallas_src>
import jax
import jax.numpy as jnp
from jax import lax
from jax.experimental import pallas as pl
from jax.experimental.pallas import tpu as pltpu

FEATS = 20  # nn.Linear(20, 20) and constant_weight (20, 20)


def fancy_mlp_kernel(x_ref, m_ref, bc_ref, wt_ref, b_ref, sum_ref, sq_ref):
    """Fused forward producing only scalar reductions.

      h = relu(x @ M + b_c)     with  M = W^T @ C,  b_c = b @ C + 1
      h = h @ W^T + b
      sum_ref[0,0] <- sum(h)
      sq_ref[0,0]  <- sum(h*h)   (squared Frobenius norm)
    """
    x = x_ref[...]                                    # (B, 20)
    h = jnp.dot(x, m_ref[...], preferred_element_type=jnp.float32) + bc_ref[...]
    h = jnp.maximum(h, 0.0)
    h = jnp.dot(h, wt_ref[...], preferred_element_type=jnp.float32) + b_ref[...]
    sum_ref[0, 0] = jnp.sum(h)
    sq_ref[0, 0] = jnp.sum(h * h)


def fancy_mlp_forward(x, w, b, c):
    """x: (B, 20) f32; w: (20, 20) Linear weight (PyTorch out x in convention);
    b: (20,); c: (20, 20) constant. Returns a scalar matching FancyMLP.forward."""
    wt = w.T                                   # W^T
    m = wt @ c                                 # constant-fold: (x@W^T+b)@C = x@(W^T C) + b@C
    bc = (b @ c + 1.0).reshape(1, FEATS)       # fused bias for first stage
    b2 = b.reshape(1, FEATS)                   # bias for second (reused) linear

    vmem = pl.BlockSpec(memory_space=pltpu.MemorySpace.VMEM)
    smem = pl.BlockSpec(memory_space=pltpu.MemorySpace.SMEM)

    s_arr, sq_arr = pl.pallas_call(
        fancy_mlp_kernel,
        out_shape=(
            jax.ShapeDtypeStruct((1, 1), jnp.float32),   # sum(h)
            jax.ShapeDtypeStruct((1, 1), jnp.float32),   # sum(h*h)
        ),
        in_specs=[vmem, vmem, vmem, vmem, vmem],
        out_specs=(smem, smem),
    )(x, m, bc, wt, b2)

    s = s_arr[0, 0]
    norm = jnp.sqrt(sq_arr[0, 0])              # Frobenius norm, == torch .norm()

    # Scalar-only equivalent of the PyTorch loop: halving the tensor halves
    # its norm and its sum exactly, so carry (norm, scale) and apply once.
    # (Scalar loop, not closed-form log2, so the strict '> 1' boundary is exact.)
    def cond_fn(carry):
        n, _ = carry
        return n > 1.0

    def body_fn(carry):
        n, sc = carry
        return n * 0.5, sc * 0.5

    norm_f, scale = lax.while_loop(cond_fn, body_fn, (norm, jnp.float32(1.0)))
    scale = jnp.where(norm_f < 0.8, scale * 10.0, scale)
    return scale * s


if __name__ == "__main__":
    key = jax.random.PRNGKey(0)
    kx, kw, kb, kc = jax.random.split(key, 4)

    batch = 2
    x = jax.random.normal(kx, (batch, FEATS), dtype=jnp.float32)

    # Deterministic synthetic parameters (shapes from nn.Linear(20, 20) and
    # torch.rand((20, 20))).
    bound = 1.0 / jnp.sqrt(FEATS)
    w = jax.random.uniform(kw, (FEATS, FEATS), jnp.float32, -bound, bound)
    b = jax.random.uniform(kb, (FEATS,), jnp.float32, -bound, bound)
    c = jax.random.uniform(kc, (FEATS, FEATS), jnp.float32, 0.0, 1.0)

    out = jax.jit(fancy_mlp_forward)(x, w, b, c)
    jax.block_until_ready(out)
    print("KERNEL_OK")
</pallas_src>

<mosaic_0001>
module attributes {stable_mosaic.version = 11 : i64} {
  func.func @fancy_mlp_kernel(%arg0: memref<2x20xf32, #tpu.memory_space<vmem>>, %arg1: memref<20x20xf32, #tpu.memory_space<vmem>>, %arg2: memref<1x20xf32, #tpu.memory_space<vmem>>, %arg3: memref<20x20xf32, #tpu.memory_space<vmem>>, %arg4: memref<1x20xf32, #tpu.memory_space<vmem>>, %arg5: memref<1x1xf32, #tpu.memory_space<smem>>, %arg6: memref<1x1xf32, #tpu.memory_space<smem>>) attributes {dimension_semantics = [], scalar_prefetch = 0 : i64, scratch_operands = 0 : i64, tpu.core_type = #tpu.core_type<tc>} {
    %c0 = arith.constant 0 : index
    %c0_0 = arith.constant 0 : index
    %0 = vector.load %arg0[%c0, %c0_0] : memref<2x20xf32, #tpu.memory_space<vmem>>, vector<2x20xf32>
    %c0_1 = arith.constant 0 : index
    %c0_2 = arith.constant 0 : index
    %1 = vector.load %arg1[%c0_1, %c0_2] : memref<20x20xf32, #tpu.memory_space<vmem>>, vector<20x20xf32>
    %cst = arith.constant dense<0.000000e+00> : vector<2x20xf32>
    %2 = tpu.matmul %0, %1, %cst {dimension_numbers = #tpu.dot_dimension_numbers<[1], [0], [0], [1], [0, 0, 1, 1], [], []>} : vector<2x20xf32>, vector<20x20xf32>, vector<2x20xf32> -> vector<2x20xf32>
    %c0_3 = arith.constant 0 : index
    %c0_4 = arith.constant 0 : index
    %3 = vector.load %arg2[%c0_3, %c0_4] : memref<1x20xf32, #tpu.memory_space<vmem>>, vector<1x20xf32>
    %4 = vector.broadcast %3 : vector<1x20xf32> to vector<2x20xf32>
    %5 = arith.addf %2, %4 : vector<2x20xf32>
    %cst_5 = arith.constant 0.000000e+00 : f32
    %6 = vector.broadcast %cst_5 : f32 to vector<2x20xf32>
    %7 = arith.maximumf %5, %6 : vector<2x20xf32>
    %c0_6 = arith.constant 0 : index
    %c0_7 = arith.constant 0 : index
    %8 = vector.load %arg3[%c0_6, %c0_7] : memref<20x20xf32, #tpu.memory_space<vmem>>, vector<20x20xf32>
    %cst_8 = arith.constant dense<0.000000e+00> : vector<2x20xf32>
    %9 = tpu.matmul %7, %8, %cst_8 {dimension_numbers = #tpu.dot_dimension_numbers<[1], [0], [0], [1], [0, 0, 1, 1], [], []>} : vector<2x20xf32>, vector<20x20xf32>, vector<2x20xf32> -> vector<2x20xf32>
    %c0_9 = arith.constant 0 : index
    %c0_10 = arith.constant 0 : index
    %10 = vector.load %arg4[%c0_9, %c0_10] : memref<1x20xf32, #tpu.memory_space<vmem>>, vector<1x20xf32>
    %11 = vector.broadcast %10 : vector<1x20xf32> to vector<2x20xf32>
    %12 = arith.addf %9, %11 : vector<2x20xf32>
    %13 = vector.shape_cast %12 : vector<2x20xf32> to vector<1x2x20xf32>
    %cst_11 = arith.constant dense<0.000000e+00> : vector<1xf32>
    %14 = vector.multi_reduction <add>, %13, %cst_11 [1, 2] : vector<1x2x20xf32> to vector<1xf32>
    %15 = vector.shape_cast %14 : vector<1xf32> to vector<1x1x1xf32>
    %16 = vector.extract %15[0, 0, 0] : f32 from vector<1x1x1xf32>
    %c0_12 = arith.constant 0 : index
    %c0_13 = arith.constant 0 : index
    %17 = memref.load %arg5[%c0_12, %c0_13] : memref<1x1xf32, #tpu.memory_space<smem>>
    memref.store %16, %arg5[%c0_12, %c0_13] : memref<1x1xf32, #tpu.memory_space<smem>>
    %18 = arith.mulf %12, %12 : vector<2x20xf32>
    %19 = vector.shape_cast %18 : vector<2x20xf32> to vector<1x2x20xf32>
    %cst_14 = arith.constant dense<0.000000e+00> : vector<1xf32>
    %20 = vector.multi_reduction <add>, %19, %cst_14 [1, 2] : vector<1x2x20xf32> to vector<1xf32>
    %21 = vector.shape_cast %20 : vector<1xf32> to vector<1x1x1xf32>
    %22 = vector.extract %21[0, 0, 0] : f32 from vector<1x1x1xf32>
    %c0_15 = arith.constant 0 : index
    %c0_16 = arith.constant 0 : index
    %23 = memref.load %arg6[%c0_15, %c0_16] : memref<1x1xf32, #tpu.memory_space<smem>>
    memref.store %22, %arg6[%c0_15, %c0_16] : memref<1x1xf32, #tpu.memory_space<smem>>
    return
  }
}

</mosaic_0001>

<bundles_post_ra>
// kernel: fancy_mlp_forward.1
= control target key start
LH: loop header
LB: loop body
LE: loop exit
PB: predicated region body
PF: predicated region fallthrough
CT: control target
= control target key end

     0   :  { %12 = vsyncpa [#allocation3], 0  ;;  %v322_v2 = vmov 0.0|0.0   ;;  %vm323_vm0 = vmmov 0   ;;  %v324_v4 = vmov 0.0   ;;  %s413_s0 = inlined_call_operand.vmem [shape: f32[2,20], index: 0, kind: input, shape index: {}]   ;;  %s414_s1 = inlined_call_operand.vmem [shape: f32[20,20], index: 1, kind: input, shape index: {}]   ;;  %s415_s2 = inlined_call_operand.vmem [shape: f32[1,20], index: 2, kind: input, shape index: {}]   ;;  %s416_s3 = inlined_call_operand.vmem [shape: f32[20,20], index: 3, kind: input, shape index: {}]   ;;  %s417_s4 = inlined_call_operand.vmem [shape: f32[1,20], index: 4, kind: input, shape index: {}]   ;;  %s418_s5 = inlined_call_operand.hbm [shape: f32[1,1], index: 5, kind: output, shape index: {0}]   ;;  %s419_s6 = inlined_call_operand.hbm [shape: f32[1,1], index: 6, kind: output, shape index: {1}]  }
   0x1   :  { %v25_v0 = vld [vmem:[%s414_s1] sm:$0xff]  ;;  %v26_v1 = vld [vmem:[%s414_s1 + $0x8] sm:$0xff]  ;;  %283 = vmatprep.subr.bf16.mxu0 %v322_v2  ;;  %286 = vmatprep.subr.bf16.mxu1 %v322_v2 }
   0x2   :  { %v284_v3 = vpack.c.bf16 %v26_v1, %v25_v0  ;;  %271 = vmatprep.mubr.msk.f32.mxu0 %vm323_vm0, %v324_v4  ;;  %280 = vmatprep.mubr.msk.f32.mxu1 %vm323_vm0, %v324_v4 }
   0x3   :  { %13 = vsyncpa [#allocation5], 0  ;;  %v27_v5 = vld [vmem:[%s414_s1 + $0x10] sm:$0xf]  ;;  %vm39_vm1 = vcmask 1043456   ;;  %vm35_vm2 = vcmask 162816  }
   0x4   :  { %285 = vmatpush3.bf16.msra.mxu0 %v284_v3  ;;  %v24_v6 = vld [vmem:[%s413_s0] sm:$0x3]  ;;  %v115_v8 = vld [vmem:[%s416_s3 + $0x8] sm:$0xff]  ;;  %v116_v10 = vld [vmem:[%s416_s3 + $0x10] sm:$0xf]  ;;  %vm200_vm3 = vcmask 156672  }
   0x5   :  { %269 = vmatprep.subr.mxu0 %v324_v4  ;;  %v114_v7 = vld [vmem:[%s416_s3] sm:$0xff]  ;;  %s298_s13 = scalar_lea.hbm %s418_s5, 16 }
   0x6   :  { %v287_v9 = vpack.c.bf16 %v115_v8, %v114_v7  ;;  %v251_v11 = vld [vmem:[%s415_s2] ss:$0 sm:$0xff]  ;;  %p299_p0 = scmp.ne.s32.totalorder %s418_s5, %s298_s13  ;;  %p302_p1 = scmp.lt.u32.totalorder %s298_s13, %s418_s5 }
   0x7   :  { %v254_v16 = vld [vmem:[%s417_s4] ss:$0 sm:$0xff] }
   0x8   :  { %270 = vmatpush3.msk.msra.mxu0 %vm39_vm1, %v27_v5  ;;  %288 = vmatpush3.bf16.msra.mxu1 %v287_v9  ;;  %p304_p2 = pnand %p302_p1, %p299_p0 }
   0x9   :  { %272 = vmatmul.mubr.msk.f32.vlgmr.msra.gmra.mrb[0].mxu0 %vm35_vm2, %v24_v6  ;;  %278 = vmatprep.subr.mxu1 %v324_v4 }
   0xc   :  { %279 = vmatpush3.msk.msra.mxu1 %vm39_vm1, %v116_v10 }
  0xdc   :  { %v109_v12 = vpop.f32.mrb[0].mxu0 }
  0xdd   :  { %v110_v13 = vadd.f32 %v251_v11, %v109_v12  ;;  %v273_v14 = vpop.f32.mrb[1].mxu0 }
  0xdf   :  { %v113_v15 = vmax.f32 %v110_v13, 0.0 }
  0xe1   :  { %281 = vmatmul.mubr.msk.f32.vlgmr.msra.gmra.mrb[0].mxu1 %vm35_vm2, %v113_v15 }
 0x1b4   :  { %v196_v17 = vpop.f32.mrb[0].mxu1 }
 0x1b5   :  { %v197_v18 = vadd.f32 %v254_v16, %v196_v17  ;;  %v282_v19 = vpop.f32.mrb[1].mxu1 }
 0x1b7   :  { %v201_v20 = vsel %vm200_vm3, %v197_v18, 0.0  ;;  %v213_v21 = vmul.f32 %v197_v18, %v197_v18 }
 0x1b8   :  { %202 = vadd.xlane.f32.xlu0 %v201_v20 }
 0x1b9   :  { %v214_v22 = vsel %vm200_vm3, %v213_v21, 0.0 }
 0x1bc   :  { %215 = vadd.xlane.f32.xlu0 %v214_v22 }
 0x245   :  { %v203_v23 = vpop.xlane.xlu0 %202 }
 0x246   :  { %v204_v24 = vrot.slane %v203_v23, 4 }
 0x248   :  { %v205_v25 = vadd.f32 %v204_v24, %v203_v23 }
 0x249   :  { %v216_v26 = vpop.xlane.xlu0 %215 }
 0x24a   :  { %v206_v27 = vrot.slane %v205_v25, 2  ;;  %v217_v28 = vrot.slane %v216_v26, 4 }
 0x24c   :  { %v218_v29 = vadd.f32 %v217_v28, %v216_v26  ;;  %v207_v30 = vadd.f32 %v206_v27, %v205_v25 }
 0x24e   :  { %v219_v31 = vrot.slane %v218_v29, 2  ;;  %v208_v32 = vrot.slane %v207_v30, 1 }
 0x250   :  { %v220_v33 = vadd.f32 %v219_v31, %v218_v29  ;;  %v209_v34 = vadd.f32 %v208_v32, %v207_v30 }
 0x252   :  { %289 = vpush %v209_v34  ;;  %v221_v35 = vrot.slane %v220_v33, 1 }
 0x254   :  { %v222_v36 = vadd.f32 %v221_v35, %v220_v33 }
 0x256   :  { %291 = vpush %v222_v36 }
 0x283   :  { %s290_s2 = spop %289 }
 0x284   :  { %212 = sst [smem:[#allocation2]] %s290_s2 }
 0x285   :  { %307 = shalt.err (!%p304_p2)
}
 0x286   :  { %s325_s18 = smov [#allocation2]   ;;  %s308_s24 = scalar_lea.hbm %s419_s6, 16 }
 0x287   :  { %233 = dma.smem_to_hbm %s325_s18, 16, %s418_s5, [#allocation3]  }
 0x288   :  { %s292_s21 = spop %291  ;;  %p309_p3 = scmp.ne.s32.totalorder %s419_s6, %s308_s24 }
 0x289   :  { %225 = sst [smem:[#allocation4]] %s292_s21  ;;  %p312_p4 = scmp.lt.u32.totalorder %s308_s24, %s419_s6 }
 0x28b   :  { %p314_p5 = pnand %p312_p4, %p309_p3 }
 0x28d   :  { %317 = shalt.err (!%p314_p5)
}
 0x28e   :  { %s326_s29 = smov [#allocation4]  }
 0x28f   :  { %241 = dma.smem_to_hbm %s326_s29, 16, %s419_s6, [#allocation5]  }
 0x290   :  { %318 = dma.done.wait [#allocation3], 16  }
 0x291   :  { %319 = vsyncadd [#allocation3], 4294967280 }
 0x292   :  { %320 = dma.done.wait [#allocation5], 16  }
 0x293   :  { %321 = vsyncadd [#allocation5], 4294967280 }
 0x294   :  { %248 = sfence }
 0x295   :  { %249 = vsyncpa [#allocation3], 1 }
 0x296   :  { %250 = vsyncpa [#allocation5], 1 }

</bundles_post_ra>
